<compile_context>
chip_gen: v7x
topology: tpu7x:2x2x1
jax: 0.10.0
libtpu: 0.0.40
codegen_flags: <defaults>
</compile_context>

<pallas_src>
import functools
import math

import jax
import jax.numpy as jnp
from jax.experimental import pallas as pl
from jax.experimental.pallas import tpu as pltpu


def _round_up(x, m):
    return ((x + m - 1) // m) * m


def _local_attention_kernel(x_ref, wqkv_ref, bqkv_ref, wout_ref, bout_ref,
                            o_ref, *, head_dim):
    """One (batch, chunk-group) tile: Cb chunk-local causal attentions.

    x_ref:    [1, Cb, Tc, Din]  bf16 zero-padded input chunks
    wqkv_ref: [3, Din, Dout]    bf16 stacked q/k/v projection weights
    bqkv_ref: [3, 1, Dout]      f32 stacked q/k/v biases
    wout_ref: [Dout, Dout]      bf16 output-projection weight
    bout_ref: [1, Dout]         f32 output-projection bias
    o_ref:    [1, Cb, Tc, Dout] bf16 output chunks
    """
    cb, tc, din = x_ref.shape[1], x_ref.shape[2], x_ref.shape[3]
    dout = wout_ref.shape[1]

    # --- Q/K/V projections: one [Cb*Tc, Din] LHS per matmul (fills MXU rows),
    #     bf16 MXU inputs with f32 accumulation. ---
    x2 = x_ref[0].reshape(cb * tc, din)                     # bf16
    q = jnp.dot(x2, wqkv_ref[0], preferred_element_type=jnp.float32) + bqkv_ref[0]
    k = jnp.dot(x2, wqkv_ref[1], preferred_element_type=jnp.float32) + bqkv_ref[1]
    v = jnp.dot(x2, wqkv_ref[2], preferred_element_type=jnp.float32) + bqkv_ref[2]
    q3 = q.astype(jnp.bfloat16).reshape(cb, tc, dout)
    k3 = k.astype(jnp.bfloat16).reshape(cb, tc, dout)
    v3 = v.astype(jnp.bfloat16).reshape(cb, tc, dout)

    # --- chunk-local causal attention, batched over the Cb chunks ---
    scores = jnp.einsum("ctd,csd->cts", q3, k3,
                        preferred_element_type=jnp.float32)
    scores = scores * (1.0 / math.sqrt(head_dim))

    # Static causal mask only.  Ragged / fully-empty padded chunks need no
    # extra (grid-dependent) masking: padded query rows are sliced away by the
    # wrapper, and col <= row < valid implies col < valid, so valid query rows
    # never see padded key columns.  Use a large negative finite constant
    # instead of -inf so padded rows can never produce NaNs.
    row = jax.lax.broadcasted_iota(jnp.int32, (cb, tc, tc), 1)
    col = jax.lax.broadcasted_iota(jnp.int32, (cb, tc, tc), 2)
    scores = jnp.where(col <= row, scores, -1e30)

    m = jnp.max(scores, axis=-1, keepdims=True)             # XLU reduce
    p = jnp.exp(scores - m)                                  # EUP, f32
    l = jnp.sum(p, axis=-1, keepdims=True)
    attn = jnp.einsum("cts,csd->ctd", p.astype(jnp.bfloat16), v3,
                      preferred_element_type=jnp.float32)
    # Flash-style normalization: one approx reciprocal (EUP) instead of a divide.
    attn = attn * pl.reciprocal(l, approx=True)

    # --- output projection, again as one [Cb*Tc, Dout] matmul ---
    out = jnp.dot(attn.astype(jnp.bfloat16).reshape(cb * tc, dout), wout_ref[...],
                  preferred_element_type=jnp.float32) + bout_ref[...]
    o_ref[0] = out.reshape(cb, tc, dout).astype(o_ref.dtype)


def _vmem_cap_bytes():
    """~75% of physical VMEM: ~48 MiB on v7x (64 MiB), ~96 MiB on v5e/v6e (128 MiB)."""
    try:
        cap = int(pltpu.get_tpu_info().vmem_capacity_bytes)
        return max(32 * 1024 * 1024, (cap * 3) // 4)
    except Exception:
        return 48 * 1024 * 1024          # conservative: fits every generation


def _target_rows():
    """Target Cb*Tc rows for the projection LHS (match the MXU tile height)."""
    try:
        kind = jax.devices()[0].device_kind.lower()
        if "v5 lite" in kind or "v5e" in kind or "v5lite" in kind:
            return 128                    # 128x128 MXU
    except Exception:
        pass
    return 256                            # v6e / v7x: 256-wide MXU


def local_attention_forward(x, params, *, block_size, num_heads):
    """x: [B, S, D_in] -> [B, S, D_out] (float32)."""
    assert num_heads == 1, "reference module only typechecks for num_heads=1"
    wqkv, bqkv, wout, bout = params
    B, S, Din = x.shape
    Dout = wqkv.shape[1] // 3

    # torch.chunk semantics: request `num_chunks`, chunk = ceil(S/num_chunks),
    # the actual number of chunks may be smaller and the last one ragged.
    num_chunks_req = S // block_size + 1
    chunk_size = -(-S // num_chunks_req)
    C = -(-S // chunk_size)                        # chunks actually produced

    Tc = _round_up(chunk_size, 16)                 # bf16 sublane-friendly rows

    # ---- choose how many chunks to block per grid step (Cb), VMEM-budgeted ----
    vmem_cap = _vmem_cap_bytes()

    def vmem_estimate(cb):
        n = cb * Tc
        tile = n * Din * 2 + n * Dout * 2                          # bf16 in/out tiles
        weights = (3 * Din * Dout + Dout * Dout) * 2 + (3 * Dout + Dout) * 4
        f32_tmp = (3 * n * Dout + 2 * cb * Tc * Tc + 2 * n * Dout) * 4
        bf16_tmp = (3 * n * Dout + cb * Tc * Tc + n * Dout) * 2
        return 2 * (tile + weights) + f32_tmp + bf16_tmp           # 2x: double buffering

    Cb = max(1, min(C, _target_rows() // Tc))
    while Cb > 1 and 2 * vmem_estimate(Cb) > vmem_cap:
        Cb = max(1, Cb // 2)
    Cg = -(-C // Cb)                               # chunk groups = grid axis 1

    # ---- wrapper-side layout prep (cheap XLA ops, done once per call, in bf16) ----
    x_b = x.astype(jnp.bfloat16)                   # cast first: halves staging traffic
    x_p = jnp.pad(x_b, ((0, 0), (0, C * chunk_size - S), (0, 0)))
    x_r = x_p.reshape(B, C, chunk_size, Din)
    x_r = jnp.pad(x_r, ((0, 0), (0, Cg * Cb - C), (0, Tc - chunk_size), (0, 0)))

    # Stacked q/k/v weights & biases: leading-axis indexing in-kernel is lane-aligned.
    wqkv_s = jnp.stack([wqkv[:, i * Dout:(i + 1) * Dout] for i in range(3)],
                       axis=0).astype(jnp.bfloat16)          # (3, Din, Dout)
    bqkv_s = jnp.stack([bqkv[:, i * Dout:(i + 1) * Dout] for i in range(3)],
                       axis=0)                               # (3, 1, Dout), f32
    wout_b = wout.astype(jnp.bfloat16)

    kernel = functools.partial(_local_attention_kernel, head_dim=Dout)

    est = vmem_estimate(Cb)
    vmem_limit = int(min(max(2 * est, 32 * 1024 * 1024), vmem_cap))

    flops = B * Cg * (2 * Cb * Tc * Din * Dout * 3            # qkv projections
                      + 2 * Cb * Tc * Tc * Dout * 2           # scores + p@v
                      + 2 * Cb * Tc * Dout * Dout)            # out projection
    bytes_accessed = (x_r.size * 2
                      + B * Cg * Cb * Tc * Dout * 2
                      + (3 * Din * Dout + Dout * Dout) * 2
                      + (3 * Dout + Dout) * 4)

    # TODO(synk): for non-toy Din/Dout, give the constant-index weight specs
    # pipeline_mode=pl.Buffered(1) (or a scratch filled once) to free VMEM.
    out_padded = pl.pallas_call(
        kernel,
        out_shape=jax.ShapeDtypeStruct((B, Cg * Cb, Tc, Dout), jnp.bfloat16),
        grid_spec=pltpu.PrefetchScalarGridSpec(
            num_scalar_prefetch=0,
            grid=(B, Cg),
            in_specs=[
                pl.BlockSpec((1, Cb, Tc, Din), lambda b, g: (b, g, 0, 0)),   # x
                pl.BlockSpec((3, Din, Dout), lambda b, g: (0, 0, 0)),        # wqkv
                pl.BlockSpec((3, 1, Dout), lambda b, g: (0, 0, 0)),          # bqkv
                pl.BlockSpec((Dout, Dout), lambda b, g: (0, 0)),             # wout
                pl.BlockSpec((1, Dout), lambda b, g: (0, 0)),                # bout
            ],
            out_specs=pl.BlockSpec((1, Cb, Tc, Dout), lambda b, g: (b, g, 0, 0)),
        ),
        compiler_params=pltpu.CompilerParams(
            dimension_semantics=("parallel", "parallel"),
            vmem_limit_bytes=vmem_limit),
        cost_estimate=pl.CostEstimate(flops=flops,
                                      transcendentals=B * Cg * Cb * Tc * Tc,
                                      bytes_accessed=bytes_accessed),
    )(x_r, wqkv_s, bqkv_s, wout_b, bout)

    # Strip chunk-row / chunk-group padding, undo the chunk reshape.
    out = out_padded[:, :C, :chunk_size, :]
    out = out.reshape(B, C * chunk_size, Dout)[:, :S, :]
    return out.astype(jnp.float32)


def local_attention_reference(x, params, *, block_size, num_heads):
    """Pure-JAX (f32) transcription of the PyTorch forward, for verification."""
    wqkv, bqkv, wout, bout = params
    B, S, _ = x.shape
    Dout = wqkv.shape[1] // 3
    H = num_heads
    hd = Dout // H
    qkv = x @ wqkv + bqkv[0]
    q, k, v = jnp.split(qkv, 3, axis=-1)

    def rsh(t):  # [B,S,Dout] -> [B,H,S,hd]
        return t.reshape(B, S, H, hd).transpose(0, 2, 1, 3)

    q, k, v = rsh(q), rsh(k), rsh(v)
    num_chunks = S // block_size + 1
    cs = -(-S // num_chunks)
    outs = []
    for start in range(0, S, cs):
        qc, kc, vc = (t[:, :, start:start + cs] for t in (q, k, v))
        L = qc.shape[2]
        s = jnp.einsum("bhqd,bhkd->bhqk", qc, kc) / math.sqrt(hd)
        m = jnp.tril(jnp.ones((L, L), dtype=bool))
        s = jnp.where(m, s, -jnp.inf)
        p = jax.nn.softmax(s, axis=-1)
        outs.append(jnp.einsum("bhqk,bhkd->bhqd", p, vc))
    attn = jnp.concatenate(outs, axis=2)            # [B,H,S,hd]
    out = attn @ wout + bout[0]                     # out_proj (needs hd == Dout)
    return out.transpose(0, 2, 1, 3).reshape(B, S, -1)


def init_params(key, input_dim, output_dim):
    k1, k2, k3, k4 = jax.random.split(key, 4)
    wqkv = jax.random.normal(k1, (input_dim, 3 * output_dim), jnp.float32) * 0.1
    bqkv = jax.random.normal(k2, (1, 3 * output_dim), jnp.float32) * 0.1
    wout = jax.random.normal(k3, (output_dim, output_dim), jnp.float32) * 0.1
    bout = jax.random.normal(k4, (1, output_dim), jnp.float32) * 0.1
    return wqkv, bqkv, wout, bout


def _check(B, S, input_dim, output_dim, block_size, key):
    kx, kp = jax.random.split(key)
    x = jax.random.normal(kx, (B, S, input_dim), jnp.float32)
    params = init_params(kp, input_dim, output_dim)
    out = local_attention_forward(x, params, block_size=block_size, num_heads=1)
    out = jax.block_until_ready(out)
    ref = local_attention_reference(x, params, block_size=block_size, num_heads=1)
    assert out.shape == (B, S, output_dim)
    # bf16 MXU inputs / bf16 output store vs a pure-f32 reference -> loose tol.
    assert jnp.allclose(out, ref, atol=5e-2, rtol=5e-2), (
        float(jnp.max(jnp.abs(out - ref))))


if __name__ == "__main__":
    key = jax.random.PRNGKey(0)
    k1, k2, k3 = jax.random.split(key, 3)
    # Original config: S=9, block_size=4 -> 3 chunks of 3 rows each.
    _check(B=2, S=9, input_dim=32, output_dim=32, block_size=4, key=k1)
    # Ragged last chunk: S=10, block_size=4 -> chunks of sizes [4, 4, 2].
    _check(B=2, S=10, input_dim=32, output_dim=32, block_size=4, key=k2)
    # Many chunks: exercises chunk-blocking with Cg > 1, empty padded chunks
    # in the last group, and a ragged (1-row) final chunk.
    _check(B=2, S=129, input_dim=32, output_dim=32, block_size=4, key=k3)
    print("KERNEL_OK")
</pallas_src>

<mosaic_0001>
module attributes {stable_mosaic.version = 11 : i64} {
  func.func @_local_attention_kernel(%arg0: i32, %arg1: i32, %arg2: memref<1x3x16x32xbf16, #tpu.memory_space<vmem>>, %arg3: memref<3x32x32xbf16, #tpu.memory_space<vmem>>, %arg4: memref<3x1x32xf32, #tpu.memory_space<vmem>>, %arg5: memref<32x32xbf16, #tpu.memory_space<vmem>>, %arg6: memref<1x32xf32, #tpu.memory_space<vmem>>, %arg7: memref<1x3x16x32xbf16, #tpu.memory_space<vmem>>) attributes {dimension_semantics = [#tpu.dimension_semantics<parallel>, #tpu.dimension_semantics<parallel>], iteration_bounds = array<i64: 2, 1>, scalar_prefetch = 0 : i64, scratch_operands = 0 : i64, tpu.core_type = #tpu.core_type<tc>, window_params = [{transform_indices = @transform_0, window_bounds = array<i64: 1, 3, 16, 32>}, {pipeline_mode = #tpu.pipeline_mode<synchronous>, transform_indices = @transform_1, window_bounds = array<i64: 3, 32, 32>}, {pipeline_mode = #tpu.pipeline_mode<synchronous>, transform_indices = @transform_2, window_bounds = array<i64: 3, 1, 32>}, {pipeline_mode = #tpu.pipeline_mode<synchronous>, transform_indices = @transform_3, window_bounds = array<i64: 32, 32>}, {pipeline_mode = #tpu.pipeline_mode<synchronous>, transform_indices = @transform_4, window_bounds = array<i64: 1, 32>}, {transform_indices = @transform_5, window_bounds = array<i64: 1, 3, 16, 32>}]} {
    %c0 = arith.constant 0 : index
    %c0_0 = arith.constant 0 : index
    %c0_1 = arith.constant 0 : index
    %c0_2 = arith.constant 0 : index
    %0 = vector.load %arg2[%c0, %c0_0, %c0_1, %c0_2] : memref<1x3x16x32xbf16, #tpu.memory_space<vmem>>, vector<1x3x16x32xbf16>
    %1 = vector.shape_cast %0 : vector<1x3x16x32xbf16> to vector<3x16x32xbf16>
    %2 = vector.shape_cast %1 : vector<3x16x32xbf16> to vector<48x32xbf16>
    %c0_3 = arith.constant 0 : index
    %c0_4 = arith.constant 0 : index
    %c0_5 = arith.constant 0 : index
    %3 = vector.load %arg3[%c0_3, %c0_4, %c0_5] : memref<3x32x32xbf16, #tpu.memory_space<vmem>>, vector<1x32x32xbf16>
    %4 = vector.shape_cast %3 : vector<1x32x32xbf16> to vector<32x32xbf16>
    %cst = arith.constant dense<0.000000e+00> : vector<48x32xf32>
    %5 = tpu.matmul %2, %4, %cst {dimension_numbers = #tpu.dot_dimension_numbers<[1], [0], [0], [1], [0, 0, 1, 1], [], []>} : vector<48x32xbf16>, vector<32x32xbf16>, vector<48x32xf32> -> vector<48x32xf32>
    %c0_6 = arith.constant 0 : index
    %c0_7 = arith.constant 0 : index
    %c0_8 = arith.constant 0 : index
    %6 = vector.load %arg4[%c0_6, %c0_7, %c0_8] : memref<3x1x32xf32, #tpu.memory_space<vmem>>, vector<1x1x32xf32>
    %7 = vector.shape_cast %6 : vector<1x1x32xf32> to vector<1x32xf32>
    %8 = vector.broadcast %7 : vector<1x32xf32> to vector<48x32xf32>
    %9 = arith.addf %5, %8 : vector<48x32xf32>
    %c1 = arith.constant 1 : index
    %c0_9 = arith.constant 0 : index
    %c0_10 = arith.constant 0 : index
    %10 = vector.load %arg3[%c1, %c0_9, %c0_10] : memref<3x32x32xbf16, #tpu.memory_space<vmem>>, vector<1x32x32xbf16>
    %11 = vector.shape_cast %10 : vector<1x32x32xbf16> to vector<32x32xbf16>
    %cst_11 = arith.constant dense<0.000000e+00> : vector<48x32xf32>
    %12 = tpu.matmul %2, %11, %cst_11 {dimension_numbers = #tpu.dot_dimension_numbers<[1], [0], [0], [1], [0, 0, 1, 1], [], []>} : vector<48x32xbf16>, vector<32x32xbf16>, vector<48x32xf32> -> vector<48x32xf32>
    %c1_12 = arith.constant 1 : index
    %c0_13 = arith.constant 0 : index
    %c0_14 = arith.constant 0 : index
    %13 = vector.load %arg4[%c1_12, %c0_13, %c0_14] : memref<3x1x32xf32, #tpu.memory_space<vmem>>, vector<1x1x32xf32>
    %14 = vector.shape_cast %13 : vector<1x1x32xf32> to vector<1x32xf32>
    %15 = vector.broadcast %14 : vector<1x32xf32> to vector<48x32xf32>
    %16 = arith.addf %12, %15 : vector<48x32xf32>
    %c2 = arith.constant 2 : index
    %c0_15 = arith.constant 0 : index
    %c0_16 = arith.constant 0 : index
    %17 = vector.load %arg3[%c2, %c0_15, %c0_16] : memref<3x32x32xbf16, #tpu.memory_space<vmem>>, vector<1x32x32xbf16>
    %18 = vector.shape_cast %17 : vector<1x32x32xbf16> to vector<32x32xbf16>
    %cst_17 = arith.constant dense<0.000000e+00> : vector<48x32xf32>
    %19 = tpu.matmul %2, %18, %cst_17 {dimension_numbers = #tpu.dot_dimension_numbers<[1], [0], [0], [1], [0, 0, 1, 1], [], []>} : vector<48x32xbf16>, vector<32x32xbf16>, vector<48x32xf32> -> vector<48x32xf32>
    %c2_18 = arith.constant 2 : index
    %c0_19 = arith.constant 0 : index
    %c0_20 = arith.constant 0 : index
    %20 = vector.load %arg4[%c2_18, %c0_19, %c0_20] : memref<3x1x32xf32, #tpu.memory_space<vmem>>, vector<1x1x32xf32>
    %21 = vector.shape_cast %20 : vector<1x1x32xf32> to vector<1x32xf32>
    %22 = vector.broadcast %21 : vector<1x32xf32> to vector<48x32xf32>
    %23 = arith.addf %19, %22 : vector<48x32xf32>
    %24 = arith.truncf %9 : vector<48x32xf32> to vector<48x32xbf16>
    %25 = vector.shape_cast %24 : vector<48x32xbf16> to vector<3x16x32xbf16>
    %26 = arith.truncf %16 : vector<48x32xf32> to vector<48x32xbf16>
    %27 = vector.shape_cast %26 : vector<48x32xbf16> to vector<3x16x32xbf16>
    %28 = arith.truncf %23 : vector<48x32xf32> to vector<48x32xbf16>
    %29 = vector.shape_cast %28 : vector<48x32xbf16> to vector<3x16x32xbf16>
    "tpu.trace_start"() <{level = 10 : i32, message = "ctd,csd->cts"}> : () -> ()
    %cst_21 = arith.constant dense<0.000000e+00> : vector<3x16x16xf32>
    %30 = tpu.matmul %25, %27, %cst_21 {dimension_numbers = #tpu.dot_dimension_numbers<[2], [2], [1], [1], [0, 0, 0, 1, 1, 1], [0], [0]>} : vector<3x16x32xbf16>, vector<3x16x32xbf16>, vector<3x16x16xf32> -> vector<3x16x16xf32>
    "tpu.trace_stop"() : () -> ()
    %cst_22 = arith.constant 0.176776692 : f32
    %31 = vector.broadcast %cst_22 : f32 to vector<3x16x16xf32>
    %32 = arith.mulf %30, %31 : vector<3x16x16xf32>
    %33 = tpu.iota {dimensions = array<i32: 1>} : vector<3x16x16xi32>
    %34 = tpu.iota {dimensions = array<i32: 2>} : vector<3x16x16xi32>
    %35 = arith.cmpi sle, %34, %33 : vector<3x16x16xi32>
    %cst_23 = arith.constant -1.000000e+30 : f32
    %36 = vector.broadcast %cst_23 : f32 to vector<3x16x16xf32>
    %37 = arith.select %35, %32, %36 : vector<3x16x16xi1>, vector<3x16x16xf32>
    %cst_24 = arith.constant dense<0xFF800000> : vector<3x16xf32>
    %38 = vector.multi_reduction <maximumf>, %37, %cst_24 [2] : vector<3x16x16xf32> to vector<3x16xf32>
    %39 = vector.shape_cast %38 : vector<3x16xf32> to vector<3x16x1xf32>
    %40 = vector.broadcast %39 : vector<3x16x1xf32> to vector<3x16x16xf32>
    %41 = arith.subf %37, %40 : vector<3x16x16xf32>
    %42 = math.exp %41 : vector<3x16x16xf32>
    %cst_25 = arith.constant dense<0.000000e+00> : vector<3x16xf32>
    %43 = vector.multi_reduction <add>, %42, %cst_25 [2] : vector<3x16x16xf32> to vector<3x16xf32>
    %44 = vector.shape_cast %43 : vector<3x16xf32> to vector<3x16x1xf32>
    %45 = arith.truncf %42 : vector<3x16x16xf32> to vector<3x16x16xbf16>
    "tpu.trace_start"() <{level = 10 : i32, message = "cts,csd->ctd"}> : () -> ()
    %cst_26 = arith.constant dense<0.000000e+00> : vector<3x16x32xf32>
    %46 = tpu.matmul %45, %29, %cst_26 {dimension_numbers = #tpu.dot_dimension_numbers<[2], [1], [1], [2], [0, 0, 0, 1, 1, 2], [0], [0]>} : vector<3x16x16xbf16>, vector<3x16x32xbf16>, vector<3x16x32xf32> -> vector<3x16x32xf32>
    "tpu.trace_stop"() : () -> ()
    %47 = tpu.reciprocal %44 {approx = true} : vector<3x16x1xf32> -> vector<3x16x1xf32>
    %48 = vector.broadcast %47 : vector<3x16x1xf32> to vector<3x16x32xf32>
    %49 = arith.mulf %46, %48 : vector<3x16x32xf32>
    %50 = arith.truncf %49 : vector<3x16x32xf32> to vector<3x16x32xbf16>
    %51 = vector.shape_cast %50 : vector<3x16x32xbf16> to vector<48x32xbf16>
    %c0_27 = arith.constant 0 : index
    %c0_28 = arith.constant 0 : index
    %52 = vector.load %arg5[%c0_27, %c0_28] : memref<32x32xbf16, #tpu.memory_space<vmem>>, vector<32x32xbf16>
    %cst_29 = arith.constant dense<0.000000e+00> : vector<48x32xf32>
    %53 = tpu.matmul %51, %52, %cst_29 {dimension_numbers = #tpu.dot_dimension_numbers<[1], [0], [0], [1], [0, 0, 1, 1], [], []>} : vector<48x32xbf16>, vector<32x32xbf16>, vector<48x32xf32> -> vector<48x32xf32>
    %c0_30 = arith.constant 0 : index
    %c0_31 = arith.constant 0 : index
    %54 = vector.load %arg6[%c0_30, %c0_31] : memref<1x32xf32, #tpu.memory_space<vmem>>, vector<1x32xf32>
    %55 = vector.broadcast %54 : vector<1x32xf32> to vector<48x32xf32>
    %56 = arith.addf %53, %55 : vector<48x32xf32>
    %57 = vector.shape_cast %56 : vector<48x32xf32> to vector<3x16x32xf32>
    %58 = arith.truncf %57 : vector<3x16x32xf32> to vector<3x16x32xbf16>
    %c0_32 = arith.constant 0 : index
    %c0_33 = arith.constant 0 : index
    %c0_34 = arith.constant 0 : index
    %c0_35 = arith.constant 0 : index
    %59 = vector.load %arg7[%c0_32, %c0_33, %c0_34, %c0_35] : memref<1x3x16x32xbf16, #tpu.memory_space<vmem>>, vector<1x3x16x32xbf16>
    %60 = vector.shape_cast %59 : vector<1x3x16x32xbf16> to vector<3x16x32xbf16>
    %61 = vector.shape_cast %58 : vector<3x16x32xbf16> to vector<1x3x16x32xbf16>
    tpu.vector_store %arg7[%c0_32, %c0_33, %c0_34, %c0_35], %61 {strides = array<i32>} : memref<1x3x16x32xbf16, #tpu.memory_space<vmem>>, vector<1x3x16x32xbf16>,
    return
  }
  func.func @transform_0(%arg0: i32, %arg1: i32) -> (i32, i32, i32, i32) {
    %c0_i32 = arith.constant 0 : i32
    %c0_i32_0 = arith.constant 0 : i32
    %c0_i32_1 = arith.constant 0 : i32
    return %arg0, %arg1, %c0_i32, %c0_i32_0 : i32, i32, i32, i32
  }
  func.func @transform_1(%arg0: i32, %arg1: i32) -> (i32, i32, i32) {
    %c0_i32 = arith.constant 0 : i32
    %c0_i32_0 = arith.constant 0 : i32
    %c0_i32_1 = arith.constant 0 : i32
    %c0_i32_2 = arith.constant 0 : i32
    return %c0_i32, %c0_i32_0, %c0_i32_1 : i32, i32, i32
  }
  func.func @transform_2(%arg0: i32, %arg1: i32) -> (i32, i32, i32) {
    %c0_i32 = arith.constant 0 : i32
    %c0_i32_0 = arith.constant 0 : i32
    %c0_i32_1 = arith.constant 0 : i32
    %c0_i32_2 = arith.constant 0 : i32
    return %c0_i32, %c0_i32_0, %c0_i32_1 : i32, i32, i32
  }
  func.func @transform_3(%arg0: i32, %arg1: i32) -> (i32, i32) {
    %c0_i32 = arith.constant 0 : i32
    %c0_i32_0 = arith.constant 0 : i32
    %c0_i32_1 = arith.constant 0 : i32
    return %c0_i32, %c0_i32_0 : i32, i32
  }
  func.func @transform_4(%arg0: i32, %arg1: i32) -> (i32, i32) {
    %c0_i32 = arith.constant 0 : i32
    %c0_i32_0 = arith.constant 0 : i32
    %c0_i32_1 = arith.constant 0 : i32
    return %c0_i32, %c0_i32_0 : i32, i32
  }
  func.func @transform_5(%arg0: i32, %arg1: i32) -> (i32, i32, i32, i32) {
    %c0_i32 = arith.constant 0 : i32
    %c0_i32_0 = arith.constant 0 : i32
    %c0_i32_1 = arith.constant 0 : i32
    return %arg0, %arg1, %c0_i32, %c0_i32_0 : i32, i32, i32, i32
  }
}

</mosaic_0001>

<bundles_post_ra>
// kernel: tpu_custom_call.1
= control target key start
LH: loop header
LB: loop body
LE: loop exit
PB: predicated region body
PF: predicated region fallthrough
CT: control target
= control target key end

     0   :  { %10 = vsyncpa [#allocation3], 0  ;;  %s2112_s0 = inlined_call_operand.hbm [shape: bf16[2,3,16,32], index: 0, kind: input, shape index: {}]   ;;  %s2113_s1 = inlined_call_operand.hbm [shape: bf16[3,32,32], index: 1, kind: input, shape index: {}]   ;;  %s2114_s2 = inlined_call_operand.vmem [shape: f32[3,1,32], index: 2, kind: input, shape index: {}]   ;;  %s2115_s3 = inlined_call_operand.hbm [shape: bf16[32,32], index: 3, kind: input, shape index: {}]   ;;  %s2116_s4 = inlined_call_operand.vmem [shape: f32[1,32], index: 4, kind: input, shape index: {}]   ;;  %s2117_s5 = inlined_call_operand.hbm [shape: bf16[2,3,16,32], index: 5, kind: output, shape index: {}]  }
   0x1   :  { %12 = vsyncpa [#allocation3 + $0x1], 0 }
   0x2   :  { %13 = vsyncpa [#allocation6], 0 }
   0x3   :  { %14 = vsyncpa [#allocation4], 0 }
   0x4   :  { %16 = vsyncpa [#allocation4 + $0x1], 0  ;;  %s1724_s18 = smov 0   ;;  %s1726_s19 = smov 0  }
   0x5   :  { %s1728_s20 = smov 0   ;;  %s1730_s21 = smov 0  }
   0x6   :  { %s1732_s22 = smov 0   ;;  %s1734_s23 = smov 0  }
   0x7 LB: > { %s1186_s24 = sadd.s32 4294967295, %s1682_s23   ;;  %s1187_s25 = sadd.s32 4294967294, %s1682_s23   ;;  %s1682_s23 = sphi %s1734_s23, %s22_s23   ;;  %s1678_s22 = sphi %s1732_s22, %s2143_s22   ;;  %s1674_s21 = sphi %s1730_s21, %s2142_s21   ;;  %s1670_s20 = sphi %s1728_s20, %s2141_s20   ;;  %s1666_s19 = sphi %s1726_s19, %s2140_s19   ;;  %s1662_s18 = sphi %s1724_s18, %s2139_s18  }
   0x8   : > { %p56_p0 = scmp.ne.s32.totalorder %s1666_s19, %s1662_s18  ;;  %p1758_p1 = scmp.eq.s32.totalorder %s1186_s24, 0 }
   0x9   : > { %p1762_p2 = scmp.eq.s32.totalorder %s1186_s24, 1  ;;  %p172_p3 = scmp.eq.s32.totalorder %s1187_s25, 1 }
   0xa   : > { %s2124_s26 = scalar_select %p1758_p1, 1, 0 }
   0xb   : > { %p1768_p4 = por %p1758_p1, %p56_p0  ;;  %p1188_p5 = scmp.ge.s32.totalorder %s1682_s23, 1 }
   0xc   : > { %p1773_p6 = por %p172_p3, %p56_p0  ;;  %p179_p7 = scmp.lt.s32.totalorder %s1682_s23, 3 }
   0xd   : > { %s2126_s28 = scalar_select %p1768_p4, 1, 0 }
   0xe   : > { %s2127_s29 = scalar_select %p1773_p6, 1, 0 }
   0xf   : > { %p1778_p8 = pnand %p1188_p5, %p179_p7  ;;  %s1684_s6 = smov [#allocation5]  }
  0x10   : > { %s191_s7 = sshll.u32 %s1684_s6, 4  ;;  %s1685_s9 = smov [#allocation7]   ;;  %s1782_s7 = int_to_ptr.vmem [resolvable:$true] %s191_s7 }
  0x11   : > { %p1398_p9 = pneg %p1778_p8  ;;  %s207_s10 = sshll.u32 %s1685_s9, 4  ;;  %s1793_s10 = int_to_ptr.vmem [resolvable:$true] %s207_s10 }
  0x12   : > { %s1510_s13 = scalar_lea.hbm %s2113_s1, 768 }
  0x13   : > { %p1789_p11 = pnand %p1398_p9, %p1758_p1  ;;  %p1511_p12 = scmp.ne.s32.totalorder %s2113_s1, %s1510_s13 }
  0x14   : > { %p1517_p5 = scmp.lt.u32.totalorder %s1510_s13, %s2113_s1 }
  0x15   : > { %p1512_p13 = pneg %p1789_p11 }
  0x17   : > { %p1513_p0 = pnand %p1512_p13, %p1511_p12 }
  0x19   : > { %p1514_p3 = pneg %p1513_p0 }
  0x1b   : > { %p1519_p7 = pnand %p1517_p5, %p1514_p3 }
  0x1d   : > { %1522 = shalt.err (!%p1519_p7)
}
  0x1e   : > { %s1523_s24 = scalar_lea.vmem %s1782_s7, 768  ;;  %p1531_p1 = scmp.lt.s32.totalorder %s1782_s7, %s1782_s7 }
  0x1f   : > { %p1524_p9 = scmp.ne.s32.totalorder %s1782_s7, %s1523_s24  ;;  %p1532_p12 = scmp.lt.s32.totalorder %s1523_s24, %s1523_s24 }
  0x21   : > { %p1526_p10 = pnand %p1524_p9, %p1512_p13  ;;  %p1533_p0 = por %p1532_p12, %p1531_p1 }
  0x23   : > { %p1527_p6 = pneg %p1526_p10 }
  0x25   : > { %p1534_p4 = pnand %p1533_p0, %p1527_p6 }
  0x27   : > { %1537 = shalt.err (!%p1534_p4)
}
  0x28   : > { %s2121_s25 = smov 64   ;;  %s2122_s6 = smov 4  }
  0x29   : > { %1401 = dma.hbm_to_vmem [thread:$0]  (!%p1789_p11), %s2113_s1, 768, %s1782_s7, [#allocation6], %s2121_s25, %s2121_s25, %s2122_s6  }
  0x2a   : > { %s1538_s14 = scalar_lea.hbm %s2115_s3, 256 }
  0x2b   : > { %p1539_p1 = scmp.ne.s32.totalorder %s2115_s3, %s1538_s14  ;;  %p1545_p10 = scmp.lt.u32.totalorder %s1538_s14, %s2115_s3 }
  0x2d   : > { %p1541_p4 = pnand %p1539_p1, %p1512_p13 }
  0x2f   : > { %p1542_p6 = pneg %p1541_p4 }
  0x31   : > { %p1547_p3 = pnand %p1545_p10, %p1542_p6 }
  0x33   : > { %1550 = shalt.err (!%p1547_p3)
}
  0x34   : > { %s1551_s7 = scalar_lea.vmem %s1793_s10, 256  ;;  %p1559_p12 = scmp.lt.s32.totalorder %s1793_s10, %s1793_s10 }
  0x35   : > { %p1552_p5 = scmp.ne.s32.totalorder %s1793_s10, %s1551_s7  ;;  %p1560_p0 = scmp.lt.s32.totalorder %s1551_s7, %s1551_s7 }
  0x37   : > { %p1554_p7 = pnand %p1552_p5, %p1512_p13  ;;  %p1561_p1 = por %p1560_p0, %p1559_p12 }
  0x39   : > { %p1555_p9 = pneg %p1554_p7 }
  0x3b   : > { %p1562_p4 = pnand %p1561_p1, %p1555_p9 }
  0x3d   : > { %1565 = shalt.err (!%p1562_p4)
}
  0x3e   : > { %1404 = dma.hbm_to_vmem [thread:$0]  (!%p1789_p11), %s2115_s3, 256, %s1793_s10, [#allocation6], %s2121_s25, %s2121_s25, %s2122_s6  }
  0x3f   : > { %s34_s8 = sadd.s32 1, %s1678_s22  ;;  %s43_s12 = sadd.s32 1, %s1670_s20 }
  0x40   : > { %p36_p13 = scmp.ge.s32.totalorder %s34_s8, 2  ;;  %p50_p6 = scmp.ne.s32.totalorder %s1670_s20, %s1666_s19 }
  0x41   : > { %p51_p10 = scmp.eq.s32.totalorder %s1682_s23, 0  ;;  %p1415_p3 = scmp.lt.s32.totalorder %s1682_s23, 2 }
  0x42   : > { %s2145_s8 = smov (%p36_p13, %s34_s8), 0  ;;  %p1863_p7 = por %p1762_p2, %p50_p6 }
  0x43   : > { %p52_p5 = por %p51_p10, %p50_p6  ;;  %s38_s14 = ssub.s32 %s1678_s22, %s2145_s8 }
  0x44   : > { %s2130_s13 = scalar_select %p1863_p7, 1, 0 }
  0x45   : > { %s224_s15 = sand.u32 1, %s1670_s20   ;;  %p41_p9 = scmp.eq.s32.totalorder %s38_s14, 0 }
  0x46   : > { %s1382_s10 = smul.u32 24, %s224_s15  ;;  %p1870_p11 = pnand %p1415_p3, %p52_p5 }
  0x47   : > { %s1875_s17 = scalar_select %p41_p9, %s1670_s20, %s43_s12  }
  0x48   : > { %s1383_s24 = smul.u32 384, %s1678_s22  ;;  %s228_s7 = scalar_lea.vmem [#allocation2], %s1382_s10 }
  0x49   : > { %s238_s9 = sshll.u32 %s228_s7, 4  ;;  %s1885_s14 = scalar_lea.sflag [#allocation3], %s224_s15  ;;  %s1883_s9 = int_to_ptr.vmem [resolvable:$true] %s238_s9 }
  0x4a   : > { %s1881_s25 = scalar_lea.hbm %s2112_s0, %s1383_s24  ;;  %p1568_p12 = pneg %p1870_p11 }
  0x4b   : > { %s1566_s6 = scalar_lea.hbm %s1881_s25, 384  ;;  %s1571_s24 = scalar_lea.hbm %s2112_s0, 768 }
  0x4c   : > { %p1567_p2 = scmp.ne.s32.totalorder %s1881_s25, %s1566_s6  ;;  %p1572_p4 = scmp.lt.u32.totalorder %s1881_s25, %s2112_s0 }
  0x4d   : > { %p1573_p13 = scmp.lt.u32.totalorder %s1571_s24, %s1566_s6  ;;  %p1575_p10 = scmp.lt.u32.totalorder %s1566_s6, %s1881_s25 }
  0x4e   : > { %p1569_p0 = pnand %p1568_p12, %p1567_p2 }
  0x4f   : > { %p1574_p6 = por %p1573_p13, %p1572_p4 }
  0x50   : > { %p1570_p1 = pneg %p1569_p0 }
  0x51   : > { %p1576_p3 = por %p1575_p10, %p1574_p6 }
  0x53   : > { %p1577_p5 = pnand %p1576_p3, %p1570_p1 }
  0x55   : > { %1580 = shalt.err (!%p1577_p5)
}
  0x56   : > { %s1581_s15 = scalar_lea.vmem %s1883_s9, 384  ;;  %s1688_s11 = smov [#allocation2]  }
  0x57   : > { %p1582_p9 = scmp.ne.s32.totalorder %s1883_s9, %s1581_s15  ;;  %s1586_s12 = sshll.u32 %s1688_s11, 4  ;;  %s1587_s12 = int_to_ptr.vmem [resolvable:$false] %s1586_s12 }
  0x58   : > { %s1588_s10 = scalar_lea.vmem %s1587_s12, 768  ;;  %p1589_p7 = scmp.lt.s32.totalorder %s1883_s9, %s1587_s12 }
  0x59   : > { %p1584_p2 = pnand %p1582_p9, %p1568_p12  ;;  %p1590_p4 = scmp.lt.s32.totalorder %s1588_s10, %s1581_s15 }
  0x5b   : > { %p1585_p0 = pneg %p1584_p2  ;;  %p1591_p13 = por %p1590_p4, %p1589_p7 }
  0x5d   : > { %p1592_p6 = pnand %p1591_p13, %p1585_p0 }
  0x5f   : > { %1595 = shalt.err (!%p1592_p6)
}
  0x60   : > { %s2132_s6 = smov 4   ;;  %s2133_s24 = smov 64  }
  0x61   : > { %1408 = dma.hbm_to_vmem [thread:$0]  (!%p1870_p11), %s1881_s25, 384, %s1883_s9, %s1885_s14, %s2133_s24, %s2133_s24, %s2132_s6  }
  0x62   : > { %250 = sbr.rel (%p1778_p8) target bundleno = 1215 (0x4bf), region = 40  ;;  %s1919_s7 = sand.u32 (!%p1778_p8), 1, %s1666_s19  }
  0x63   : > { %s1384_s27 = smul.u32 (!%p1778_p8), 24, %s1919_s7  ;;  %s253_s15 = scalar_lea.sflag (!%p1778_p8), [#allocation3], %s1919_s7 }
  0x64   : > { %p2134_p7 = scmp.ne.s32.totalorder (!%p1778_p8), %s2126_s28, 0 }
  0x65   : > { %s1925_s16 = scalar_lea.vmem (!%p1778_p8), [#allocation2], %s1384_s27 }
  0x69   : > { %1649 = dma.done.wait (%p2134_p7), %s253_s15, 384  }
  0x6a   : > { %1651 = vsyncadd (%p2134_p7), %s253_s15, 4294966912  ;;  %p2135_p11 = scmp.ne.s32.totalorder %s2124_s26, 0 }
  0x6c   : > { %1653 = dma.done.wait (%p2135_p11), [#allocation6], 1024  }
  0x6d   : > { %1655 = vsyncadd (%p2135_p11), [#allocation6], 4294966272  ;;  %v1689_v0 = vmov 0.0   ;;  %vm1690_vm0 = vmmov 0   ;;  %v1475_v1 = vld [vmem:[#allocation5] sm:$0xff]   ;;  %v1476_v2 = vld [vmem:[#allocation5 + $0x8] sm:$0xff]  }
  0x6e   : > { %1278 = vmatprep.subr.bf16.mxu0 %v1689_v0  ;;  %1282 = vmatprep.mubr.msk.bf16.mxu0 %vm1690_vm0, %v1689_v0  ;;  %v1479_v3 = vld [vmem:[#allocation5 + $0x10] sm:$0xff]   ;;  %vm338_vm1 = vcmask 261120   ;;  %v1481_v5 = vld [vmem:[#allocation5 + $0x18] sm:$0xff]   ;;  %v1482_v8 = vld [vmem:[#allocation5 + $0x20] sm:$0xff]   ;;  %vm738_vm3 = vcmask 130048   ;;  %vm1056_vm5 = vcmask 257024  }
  0x6f   : > { %1378 = vmatprep.subr.bf16.mxu1 %v1689_v0  ;;  %1302 = vmatprep.mubr.msk.bf16.mxu1 %vm1690_vm0, %v1689_v0  ;;  %v1477_v4 = vld [vmem:[%s1925_s16] sm:$0xff]   ;;  %v1478_v6 = vld [vmem:[%s1925_s16 + $0x8] sm:$0xff]   ;;  %v1480_v7 = vld [vmem:[%s1925_s16 + $0x10] sm:$0xff]   ;;  %s290_s10 = scalar_lea.vmem [#allocation8], %s1384_s27  ;;  %s1385_s24 = smul.u32 384, %s1674_s21 }
  0x70   : > { %1279 = vmatpush3.bf16.msra.mxu0 %v1475_v1  ;;  %1380 = vmatpush3.bf16.msra.mxu1 %v1479_v3  ;;  %v1483_v9 = vld [vmem:[#allocation5 + $0x28] sm:$0xff]   ;;  %v1196_v10 = vld [vmem:[%s2114_s2] ss:$0 sm:$0xff]  ;;  %v1206_v18 = vld [vmem:[%s2114_s2 + $0x1] ss:$0 sm:$0xff]  ;;  %s1080_s6 = sshll.u32 %s290_s10, 4  ;;  %s2056_s6 = int_to_ptr.vmem [resolvable:$true] %s1080_s6 }
  0x71   : > { %1280 = vmatprep.subr.bf16.mxu0 %v1689_v0  ;;  %1379 = vmatprep.subr.bf16.mxu1 %v1689_v0  ;;  %v2003_v57 = vld [vmem:[%s2114_s2 + $0x2] ss:$0 sm:$0xff]  ;;  %s2061_s16 = scalar_lea.hbm %s2117_s5, %s1385_s24  ;;  %s1064_s21 = scalar_lea.sflag [#allocation4], %s1919_s7 }
  0x72   : > { %s1596_s26 = scalar_lea.vmem %s2056_s6, 384  ;;  %p2136_p12 = scmp.ne.s32.totalorder %s2130_s13, 0 }
  0x73   : > { %p1597_p8 = scmp.ne.s32.totalorder %s2056_s6, %s1596_s26  ;;  %s1691_s28 = smov [#allocation8]  }
  0x74   : > { %1281 = vmatpush3.bf16.msra.mxu0 %v1476_v2  ;;  %1381 = vmatpush3.bf16.msra.mxu1 %v1481_v5  ;;  %v725_v2 = vlaneseq  ;;  %s1600_s30 = sshll.u32 %s1691_s28, 4  ;;  %s1601_s30 = int_to_ptr.vmem [resolvable:$false] %s1600_s30 }
  0x75   : > { %1294 = vmatprep.subr.bf16.mxu0 %v1689_v0  ;;  %1326 = vmatprep.subr.bf16.mxu1 %v1689_v0  ;;  %p1598_p1 = pnand %p1597_p8, %p2136_p12  ;;  %s1602_s25 = scalar_lea.vmem %s1601_s30, 768 }
  0x76   : > { %p1603_p3 = scmp.lt.s32.totalorder %s2056_s6, %s1601_s30  ;;  %p1604_p5 = scmp.lt.s32.totalorder %s1602_s25, %s1596_s26 }
  0x77   : > { %1283 = vmatmul.mubr.msk.bf16.vlgmr.msra.gmra.mrb[0].mxu0 %vm338_vm1, %v1477_v4  ;;  %1303 = vmatmul.mubr.msk.bf16.vlgmr.msra.gmra.mrb[0].mxu1 %vm338_vm1, %v1478_v6  ;;  %p1599_p10 = pneg %p1598_p1 }
  0x78   : > { %1286 = vmatprep.mubr.msk.bf16.mxu0 %vm1690_vm0, %v1689_v0  ;;  %1295 = vmatpush3.bf16.msra.mxu0 %v1479_v3  ;;  %v726_v3 = vshrl.u32 %v725_v2, 7  ;;  %p1605_p9 = por %p1604_p5, %p1603_p3 }
  0x79   : > { %1296 = vmatprep.subr.bf16.mxu0 %v1689_v0  ;;  %1306 = vmatprep.mubr.msk.bf16.mxu1 %vm1690_vm0, %v1689_v0 }
  0x7a   : > { %p1606_p2 = pnand %p1605_p9, %p1599_p10 }
  0x7c   : > { %1297 = vmatpush3.bf16.msra.mxu0 %v1481_v5  ;;  %v727_v5 = vadd.s32 8, %v726_v3 }
  0x7d   : > { %1310 = vmatprep.subr.bf16.mxu0 %v1689_v0 }
  0x7f   : > { %1287 = vmatmul.mubr.msk.bf16.gmra.mrb[4].mxu0 %vm338_vm1, %v1478_v6  ;;  %1307 = vmatmul.mubr.msk.bf16.gmra.mrb[4].mxu1 %vm338_vm1, %v1480_v7 }
  0x80   : > { %1290 = vmatprep.mubr.msk.bf16.mxu0 %vm1690_vm0, %v1689_v0  ;;  %1328 = vmatprep.mubr.msk.bf16.mxu1 %vm1690_vm0, %v1689_v0 }
  0x87   : > { %1291 = vmatmul.mubr.msk.bf16.gmra.mrb[8].mxu0 %vm338_vm1, %v1480_v7 }
  0x88   : > { %1298 = vmatprep.mubr.msk.bf16.mxu0 %vm1690_vm0, %v1689_v0 }
  0x8f   : > { %1299 = vmatmul.mubr.msk.bf16.vlgmr.msra.gmra.mrb[12].mxu0 %vm338_vm1, %v1477_v4 }
  0x90   : > { %1314 = vmatprep.mubr.msk.bf16.mxu0 %vm1690_vm0, %v1689_v0  ;;  %1311 = vmatpush3.bf16.msra.mxu0 %v1482_v8 }
  0x91   : > { %1312 = vmatprep.subr.bf16.mxu0 %v1689_v0 }
  0x94   : > { %1313 = vmatpush3.bf16.msra.mxu0 %v1483_v9 }
  0x95   : > { %1344 = vmatprep.subr.bf16.mxu0 %v1689_v0 }
  0x97   : > { %1315 = vmatmul.mubr.msk.bf16.vlgmr.msra.gmra.mrb[16].mxu0 %vm338_vm1, %v1477_v4  ;;  %v729_v4 = vand.u32 127, %v725_v2 }
  0x98   : > { %1318 = vmatprep.mubr.msk.bf16.mxu0 %vm1690_vm0, %v1689_v0 }
  0x99   : > { %vm730_vm2 = vcmp.le.s32.totalorder %v729_v4, %v726_v3  ;;  %vm731_vm4 = vcmp.le.s32.totalorder %v729_v4, %v727_v5 }
  0x9f   : > { %1319 = vmatmul.mubr.msk.bf16.gmra.mrb[20].mxu0 %vm338_vm1, %v1478_v6 }
  0xa0   : > { %1322 = vmatprep.mubr.msk.bf16.mxu0 %vm1690_vm0, %v1689_v0 }
  0xa7   : > { %1323 = vmatmul.mubr.msk.bf16.gmra.mrb[24].mxu0 %vm338_vm1, %v1480_v7 }
  0xa8   : > { %1346 = vmatprep.mubr.msk.bf16.mxu0 %vm1690_vm0, %v1689_v0 }
 0x14a   : > { %v382_v11 = vpop.f32.mrb[0].mxu0  ;;  %v472_v19 = vpop.f32.mrb[0].mxu1 }
 0x14b   : > { %v1284_v12 = vpop.f32.mrb[1].mxu0  ;;  %v383_v14 = vadd.f32 %v1196_v10, %v382_v11  ;;  %v473_v20 = vadd.f32 %v1206_v18, %v472_v19  ;;  %v1304_v21 = vpop.f32.mrb[1].mxu1 }
 0x14c   : > { %v385_v13 = vpop.f32.mrb[2].mxu0  ;;  %v475_v22 = vpop.f32.mrb[2].mxu1 }
 0x14d   : > { %v386_v15 = vadd.f32 %v1196_v10, %v385_v13  ;;  %v1285_v16 = vpop.f32.mrb[3].mxu0  ;;  %v476_v24 = vadd.f32 %v1206_v18, %v475_v22  ;;  %v1305_v25 = vpop.f32.mrb[3].mxu1 }
 0x14f   : > { %v569_v17 = vpack.c.bf16 %v386_v15, %v383_v14  ;;  %v573_v28 = vpack.c.bf16 %v476_v24, %v473_v20 }
 0x151   : > { %v629_v55 = vsel %vm338_vm1, %v573_v28, 0 }
 0x152   : > { %v390_v23 = vpop.f32.mrb[4].mxu0  ;;  %v480_v33 = vpop.f32.mrb[4].mxu1 }
 0x153   : > { %v1288_v26 = vpop.f32.mrb[5].mxu0  ;;  %v391_v29 = vadd.f32 %v1196_v10, %v390_v23  ;;  %v481_v34 = vadd.f32 %v1206_v18, %v480_v33  ;;  %v1308_v35 = vpop.f32.mrb[5].mxu1 }
 0x154   : > { %v393_v27 = vpop.f32.mrb[6].mxu0  ;;  %v483_v36 = vpop.f32.mrb[6].mxu1 }
 0x155   : > { %v394_v30 = vadd.f32 %v1196_v10, %v393_v27  ;;  %v1289_v31 = vpop.f32.mrb[7].mxu0  ;;  %v484_v38 = vadd.f32 %v1206_v18, %v483_v36  ;;  %v1309_v39 = vpop.f32.mrb[7].mxu1 }
 0x157   : > { %v570_v32 = vpack.c.bf16 %v394_v30, %v391_v29  ;;  %v574_v42 = vpack.c.bf16 %v484_v38, %v481_v34 }
 0x159   : > { %v676_v56 = vsel %vm338_vm1, %v574_v42, 0 }
 0x15a   : > { %v398_v37 = vpop.f32.mrb[8].mxu0 }
 0x15b   : > { %v1292_v40 = vpop.f32.mrb[9].mxu0  ;;  %v399_v43 = vadd.f32 %v1196_v10, %v398_v37 }
 0x15c   : > { %v401_v41 = vpop.f32.mrb[10].mxu0 }
 0x15d   : > { %v402_v44 = vadd.f32 %v1196_v10, %v401_v41  ;;  %v1293_v45 = vpop.f32.mrb[11].mxu0 }
 0x15f   : > { %v571_v46 = vpack.c.bf16 %v402_v44, %v399_v43 }
 0x162   : > { %v464_v47 = vpop.f32.mrb[12].mxu0 }
 0x163   : > { %v1300_v48 = vpop.f32.mrb[13].mxu0  ;;  %v465_v50 = vadd.f32 %v1206_v18, %v464_v47 }
 0x164   : > { %v467_v49 = vpop.f32.mrb[14].mxu0 }
 0x165   : > { %v468_v51 = vadd.f32 %v1206_v18, %v467_v49  ;;  %v1301_v52 = vpop.f32.mrb[15].mxu0 }
 0x167   : > { %v572_v53 = vpack.c.bf16 %v468_v51, %v465_v50 }
 0x169   : > { %v582_v54 = vsel %vm338_vm1, %v572_v53, 0 }
 0x16a   : > { %1327 = vmatpush3.bf16.xpose.msra.mxu1 %v582_v54  ;;  %v546_v58 = vpop.f32.mrb[16].mxu0 }
 0x16b   : > { %1332 = vmatprep.subr.bf16.mxu1 %v1689_v0  ;;  %v547_v59 = vadd.f32 %v2003_v57, %v546_v58  ;;  %v1316_v60 = vpop.f32.mrb[17].mxu0 }
 0x16c   : > { %v549_v61 = vpop.f32.mrb[18].mxu0 }
 0x16d   : > { %v550_v62 = vadd.f32 %v2003_v57, %v549_v61  ;;  %v1317_v63 = vpop.f32.mrb[19].mxu0 }
 0x16f   : > { %v575_v1 = vpack.c.bf16 %v550_v62, %v547_v59 }
 0x171   : > { %1329 = vmatmul.mubr.msk.bf16.vlgmr.msra.gmra.mrb[8].mxu1 %vm338_vm1, %v569_v17  ;;  %1345 = vmatpush3.bf16.msra.mxu0 %v575_v1 }
 0x172   : > { %1333 = vmatpush3.bf16.xpose.msra.mxu1 %v629_v55  ;;  %1334 = vmatprep.mubr.msk.bf16.mxu1 %vm1690_vm0, %v1689_v0  ;;  %v554_v36 = vpop.f32.mrb[20].mxu0 }
 0x173   : > { %1338 = vmatprep.subr.bf16.mxu1 %v1689_v0  ;;  %1356 = vmatprep.subr.bf16.mxu0 %v1689_v0  ;;  %v1320_v37 = vpop.f32.mrb[21].mxu0  ;;  %v555_v40 = vadd.f32 %v2003_v57, %v554_v36 }
 0x174   : > { %v557_v38 = vpop.f32.mrb[22].mxu0 }
 0x175   : > { %v1321_v39 = vpop.f32.mrb[23].mxu0  ;;  %v558_v41 = vadd.f32 %v2003_v57, %v557_v38 }
 0x177   : > { %v576_v42 = vpack.c.bf16 %v558_v41, %v555_v40 }
 0x179   : > { %1335 = vmatmul.mubr.msk.bf16.vlgmr.msra.gmra.mrb[12].mxu1 %vm338_vm1, %v570_v32 }
 0x17a   : > { %1339 = vmatpush3.bf16.xpose.msra.mxu1 %v676_v56  ;;  %1340 = vmatprep.mubr.msk.bf16.mxu1 %vm1690_vm0, %v1689_v0  ;;  %v562_v43 = vpop.f32.mrb[24].mxu0 }
 0x17b   : > { %1350 = vmatprep.subr.bf16.mxu1 %v1689_v0  ;;  %v563_v44 = vadd.f32 %v2003_v57, %v562_v43  ;;  %v1324_v45 = vpop.f32.mrb[25].mxu0 }
 0x181   : > { %1341 = vmatmul.mubr.msk.bf16.vlgmr.msra.gmra.mrb[16].mxu1 %vm338_vm1, %v571_v46  ;;  %v565_v46 = vpop.f32.mrb[26].mxu0 }
 0x182   : > { %1352 = vmatprep.mubr.msk.bf16.mxu1 %vm1690_vm0, %v1689_v0  ;;  %1351 = vmatpush3.bf16.msra.mxu1 %v576_v42  ;;  %v566_v47 = vadd.f32 %v2003_v57, %v565_v46  ;;  %v1325_v48 = vpop.f32.mrb[27].mxu0 }
 0x183   : > { %1362 = vmatprep.subr.bf16.mxu1 %v1689_v0 }
 0x184   : > { %v577_v49 = vpack.c.bf16 %v566_v47, %v563_v44 }
 0x244   : > { %v618_v6 = vpop.f32.mrb[8].mxu1 }
 0x245   : > { %v719_v7 = vmul.f32 0.17677669, %v618_v6  ;;  %v1330_v8 = vpop.f32.mrb[9].mxu1 }
 0x246   : > { %v621_v9 = vpop.f32.mrb[10].mxu1 }
 0x247   : > { %v720_v10 = vmul.f32 0.17677669, %v621_v9  ;;  %v1331_v11 = vpop.f32.mrb[11].mxu1  ;;  %v732_v12 = vsel %vm730_vm2, %v719_v7, -1e+30 }
 0x248   : > { %v739_v13 = vsel %vm738_vm3, %v732_v12, -inf }
 0x249   : > { %740 = vmax.xlane.f32.xlu0 %v739_v13  ;;  %v733_v14 = vsel %vm731_vm4, %v720_v10, -1e+30 }
 0x24a   : > { %v742_v16 = vsel %vm738_vm3, %v733_v14, -inf }
 0x24c   : > { %v665_v15 = vpop.f32.mrb[12].mxu1 }
 0x24d   : > { %v721_v17 = vmul.f32 0.17677669, %v665_v15  ;;  %743 = vmax.xlane.f32.xlu0 %v742_v16  ;;  %v1336_v18 = vpop.f32.mrb[13].mxu1 }
 0x24e   : > { %v668_v19 = vpop.f32.mrb[14].mxu1 }
 0x24f   : > { %v722_v20 = vmul.f32 0.17677669, %v668_v19  ;;  %v1337_v21 = vpop.f32.mrb[15].mxu1  ;;  %v734_v22 = vsel %vm730_vm2, %v721_v17, -1e+30 }
 0x250   : > { %v745_v23 = vsel %vm738_vm3, %v734_v22, -inf  ;;  %v1485_v21 = vld [vmem:[#allocation7 + $0x8] sm:$0xff]  }
 0x251   : > { %746 = vmax.xlane.f32.xlu1 %v745_v23  ;;  %v735_v24 = vsel %vm731_vm4, %v722_v20, -1e+30  ;;  %v1484_v20 = vld [vmem:[#allocation7] sm:$0xff]  }
 0x252   : > { %v748_v26 = vsel %vm738_vm3, %v735_v24, -inf }
 0x254   : > { %v712_v25 = vpop.f32.mrb[16].mxu1 }
 0x255   : > { %v723_v27 = vmul.f32 0.17677669, %v712_v25  ;;  %749 = vmax.xlane.f32.xlu1 %v748_v26  ;;  %v1342_v28 = vpop.f32.mrb[17].mxu1 }
 0x256   : > { %v715_v29 = vpop.f32.mrb[18].mxu1 }
 0x257   : > { %v724_v30 = vmul.f32 0.17677669, %v715_v29  ;;  %v1343_v31 = vpop.f32.mrb[19].mxu1  ;;  %v736_v32 = vsel %vm730_vm2, %v723_v27, -1e+30 }
 0x258   : > { %v751_v33 = vsel %vm738_vm3, %v736_v32, -inf }
 0x259   : > { %752 = vmax.xlane.f32.xlu0 %v751_v33  ;;  %v737_v34 = vsel %vm731_vm4, %v724_v30, -1e+30 }
 0x25a   : > { %v754_v35 = vsel %vm738_vm3, %v737_v34, -inf }
 0x25b   : > { %755 = vmax.xlane.f32.xlu1 %v754_v35 }
 0x2d6   : > { %v741_v50 = vpop.xlane.xlu0 %740 }
 0x2d7   : > { %v757_v51 = vsub.f32 %v732_v12, %v741_v50 }
 0x2d9   : > { %v763_v52 = vmul.f32 1.442695, %v757_v51 }
 0x2da   : > { %v744_v53 = vpop.xlane.xlu0 %743 }
 0x2db   : > { %1486 = vpow2.f32 %v763_v52  ;;  %v758_v54 = vsub.f32 %v733_v14, %v744_v53 }
 0x2dd   : > { %v765_v55 = vmul.f32 1.442695, %v758_v54 }
 0x2de   : > { %v747_v56 = vpop.xlane.xlu1 %746 }
 0x2df   : > { %1488 = vpow2.f32 %v765_v55  ;;  %v759_v58 = vsub.f32 %v734_v22, %v747_v56  ;;  %v1225_v55 = vld [vmem:[%s2116_s4] ss:$0 sm:$0xff] }
 0x2e1   : > { %v767_v59 = vmul.f32 1.442695, %v759_v58 }
 0x2e2   : > { %v750_v60 = vpop.xlane.xlu1 %749 }
 0x2e3   : > { %1490 = vpow2.f32 %v767_v59  ;;  %v760_v61 = vsub.f32 %v735_v24, %v750_v60 }
 0x2e5   : > { %v1487_v62 = vpop.eup %1486  ;;  %v769_v63 = vmul.f32 1.442695, %v760_v61 }
 0x2e6   : > { %v753_v1 = vpop.xlane.xlu0 %752  ;;  %v775_v57 = vsel %vm738_vm3, %v1487_v62, 0.0 }
 0x2e7   : > { %1492 = vpow2.f32 %v769_v63  ;;  %v761_v2 = vsub.f32 %v736_v32, %v753_v1  ;;  %776 = vadd.xlane.f32.xlu0 %v775_v57 }
 0x2e8   : > { %v756_v3 = vpop.xlane.xlu1 %755 }
 0x2e9   : > { %v1489_v4 = vpop.eup %1488  ;;  %v771_v5 = vmul.f32 1.442695, %v761_v2  ;;  %v762_v6 = vsub.f32 %v737_v34, %v756_v3 }
 0x2ea   : > { %v793_v7 = vpack.c.bf16 %v1489_v4, %v1487_v62  ;;  %v778_v8 = vsel %vm738_vm3, %v1489_v4, 0.0 }
 0x2eb   : > { %1494 = vpow2.f32 %v771_v5  ;;  %v773_v9 = vmul.f32 1.442695, %v762_v6  ;;  %779 = vadd.xlane.f32.xlu1 %v778_v8 }
 0x2ec   : > { %1347 = vmatmul.mubr.msk.bf16.vlgmr.msra.gmra.mrb[28].mxu0 %vm738_vm3, %v793_v7 }
 0x2ed   : > { %v1491_v10 = vpop.eup %1490  ;;  %1496 = vpow2.f32 %v773_v9  ;;  %1357 = vmatpush3.bf16.msra.mxu0 %v577_v49  ;;  %1358 = vmatprep.mubr.msk.bf16.mxu0 %vm1690_vm0, %v1689_v0 }
 0x2ee   : > { %v781_v11 = vsel %vm738_vm3, %v1491_v10, 0.0 }
 0x2ef   : > { %782 = vadd.xlane.f32.xlu0 %v781_v11 }
 0x2f1   : > { %v1493_v12 = vpop.eup %1492 }
 0x2f2   : > { %v784_v13 = vsel %vm738_vm3, %v1493_v12, 0.0  ;;  %v794_v14 = vpack.c.bf16 %v1493_v12, %v1491_v10 }
 0x2f3   : > { %785 = vadd.xlane.f32.xlu1 %v784_v13 }
 0x2f4   : > { %1353 = vmatmul.mubr.msk.bf16.vlgmr.msra.gmra.mrb[20].mxu1 %vm738_vm3, %v794_v14 }
 0x2f5   : > { %v1495_v15 = vpop.eup %1494  ;;  %1366 = vmatprep.mubr.msk.bf16.mxu1 %vm1690_vm0, %v1689_v0  ;;  %1363 = vmatpush3.bf16.msra.mxu1 %v1484_v20 }
 0x2f6   : > { %v787_v16 = vsel %vm738_vm3, %v1495_v15, 0.0  ;;  %1364 = vmatprep.subr.bf16.mxu1 %v1689_v0 }
 0x2f7   : > { %v1497_v17 = vpop.eup %1496  ;;  %788 = vadd.xlane.f32.xlu0 %v787_v16 }
 0x2f8   : > { %v790_v18 = vsel %vm738_vm3, %v1497_v17, 0.0  ;;  %v795_v19 = vpack.c.bf16 %v1497_v17, %v1495_v15 }
 0x2f9   : > { %791 = vadd.xlane.f32.xlu1 %v790_v18  ;;  %1365 = vmatpush3.bf16.msra.mxu1 %v1485_v21 }
 0x2fa   : > { %1359 = vmatmul.mubr.msk.bf16.vlgmr.msra.gmra.mrb[32].mxu0 %vm738_vm3, %v795_v19 }
 0x374   : > { %v777_v22 = vpop.xlane.xlu0 %776 }
 0x375   : > { %1498 = vrcp.f32 %v777_v22 }
 0x378   : > { %v780_v23 = vpop.xlane.xlu1 %779 }
 0x379   : > { %1500 = vrcp.f32 %v780_v23 }
 0x37c   : > { %v783_v24 = vpop.xlane.xlu0 %782 }
 0x37d   : > { %1502 = vrcp.f32 %v783_v24 }
 0x37f   : > { %v1499_v27 = vpop.eup %1498 }
 0x380   : > { %v786_v25 = vpop.xlane.xlu1 %785 }
 0x381   : > { %1504 = vrcp.f32 %v786_v25 }
 0x383   : > { %v1501_v29 = vpop.eup %1500 }
 0x384   : > { %v789_v30 = vpop.xlane.xlu0 %788 }
 0x385   : > { %1506 = vrcp.f32 %v789_v30 }
 0x386   : > { %v792_v32 = vpop.xlane.xlu1 %791 }
 0x387   : > { %1508 = vrcp.f32 %v792_v32  ;;  %v1503_v38 = vpop.eup %1502 }
 0x38b   : > { %v1505_v40 = vpop.eup %1504 }
 0x38f   : > { %v1507_v47 = vpop.eup %1506 }
 0x391   : > { %v1509_v49 = vpop.eup %1508 }
 0x3bf   : > { %v833_v26 = vpop.f32.mrb[28].mxu0 }
 0x3c0   : > { %v1348_v28 = vpop.f32.mrb[29].mxu0  ;;  %v934_v33 = vmul.f32 %v1499_v27, %v833_v26 }
 0x3c1   : > { %v836_v31 = vpop.f32.mrb[30].mxu0 }
 0x3c2   : > { %v935_v34 = vmul.f32 %v1501_v29, %v836_v31  ;;  %v1349_v35 = vpop.f32.mrb[31].mxu0 }
 0x3c4   : > { %v940_v36 = vpack.c.bf16 %v935_v34, %v934_v33 }
 0x3c6   : > { %1367 = vmatmul.mubr.msk.bf16.vlgmr.msra.gmra.mrb[24].mxu1 %vm338_vm1, %v940_v36 }
 0x3c7   : > { %v877_v37 = vpop.f32.mrb[20].mxu1  ;;  %1370 = vmatprep.mubr.msk.bf16.mxu1 %vm1690_vm0, %v1689_v0 }
 0x3c8   : > { %v1354_v39 = vpop.f32.mrb[21].mxu1  ;;  %v936_v42 = vmul.f32 %v1503_v38, %v877_v37 }
 0x3c9   : > { %v880_v41 = vpop.f32.mrb[22].mxu1 }
 0x3ca   : > { %v937_v43 = vmul.f32 %v1505_v40, %v880_v41  ;;  %v1355_v44 = vpop.f32.mrb[23].mxu1 }
 0x3cc   : > { %v941_v45 = vpack.c.bf16 %v937_v43, %v936_v42 }
 0x3cd   : > { %v921_v46 = vpop.f32.mrb[32].mxu0 }
 0x3ce   : > { %v1360_v48 = vpop.f32.mrb[33].mxu0  ;;  %1371 = vmatmul.mubr.msk.bf16.gmra.mrb[28].mxu1 %vm338_vm1, %v941_v45  ;;  %v938_v51 = vmul.f32 %v1507_v47, %v921_v46 }
 0x3cf   : > { %v924_v50 = vpop.f32.mrb[34].mxu0  ;;  %1374 = vmatprep.mubr.msk.bf16.mxu1 %vm1690_vm0, %v1689_v0 }
 0x3d0   : > { %v939_v52 = vmul.f32 %v1509_v49, %v924_v50  ;;  %v1361_v53 = vpop.f32.mrb[35].mxu0 }
 0x3d2   : > { %v942_v54 = vpack.c.bf16 %v939_v52, %v938_v51 }
 0x3d6   : > { %1375 = vmatmul.mubr.msk.bf16.gmra.mrb[32].mxu1 %vm338_vm1, %v942_v54 }
 0x499   : > { %v1009_v56 = vpop.f32.mrb[24].mxu1 }
 0x49a   : > { %v1010_v58 = vadd.f32 %v1225_v55, %v1009_v56  ;;  %v1368_v59 = vpop.f32.mrb[25].mxu1 }
 0x49b   : > { %v1012_v60 = vpop.f32.mrb[26].mxu1 }
 0x49c   : > { %v1240_v61 = vpack.c.bf16 %v1010_v58, %v1010_v58  ;;  %v1013_v62 = vadd.f32 %v1225_v55, %v1012_v60  ;;  %v1369_v63 = vpop.f32.mrb[27].mxu1 }
 0x49e   : > { %1057 = vst.msk [vmem:[%s290_s10] sm:$0xf] %vm1056_vm5, %v1240_v61  ;;  %v1241_v0 = vpack.c.bf16 %v1013_v62, %v1013_v62 }
 0x4a0   : > { %1058 = vst.msk [vmem:[%s290_s10 + $0x4] sm:$0xf] %vm1056_vm5, %v1241_v0 }
 0x4a1   : > { %v1017_v1 = vpop.f32.mrb[28].mxu1 }
 0x4a2   : > { %v1018_v57 = vadd.f32 %v1225_v55, %v1017_v1  ;;  %v1372_v2 = vpop.f32.mrb[29].mxu1 }
 0x4a3   : > { %v1020_v3 = vpop.f32.mrb[30].mxu1 }
 0x4a4   : > { %v1242_v4 = vpack.c.bf16 %v1018_v57, %v1018_v57  ;;  %v1021_v5 = vadd.f32 %v1225_v55, %v1020_v3  ;;  %v1373_v6 = vpop.f32.mrb[31].mxu1 }
 0x4a6   : > { %1059 = vst.msk [vmem:[%s290_s10 + $0x8] sm:$0xf] %vm1056_vm5, %v1242_v4  ;;  %v1243_v7 = vpack.c.bf16 %v1021_v5, %v1021_v5 }
 0x4a8   : > { %1060 = vst.msk [vmem:[%s290_s10 + $0xc] sm:$0xf] %vm1056_vm5, %v1243_v7 }
 0x4a9   : > { %v1025_v8 = vpop.f32.mrb[32].mxu1 }
 0x4aa   : > { %v1026_v9 = vadd.f32 %v1225_v55, %v1025_v8  ;;  %v1376_v10 = vpop.f32.mrb[33].mxu1 }
 0x4ab   : > { %v1028_v11 = vpop.f32.mrb[34].mxu1 }
 0x4ac   : > { %v1244_v12 = vpack.c.bf16 %v1026_v9, %v1026_v9  ;;  %v1029_v13 = vadd.f32 %v1225_v55, %v1028_v11  ;;  %v1377_v14 = vpop.f32.mrb[35].mxu1 }
 0x4ae   : > { %1061 = vst.msk [vmem:[%s290_s10 + $0x10] sm:$0xf] %vm1056_vm5, %v1244_v12  ;;  %v1245_v15 = vpack.c.bf16 %v1029_v13, %v1029_v13 }
 0x4b0   : > { %1062 = vst.msk [vmem:[%s290_s10 + $0x14] sm:$0xf] %vm1056_vm5, %v1245_v15 }
 0x4b1   : > { %1609 = shalt.err (!%p1606_p2)
}
 0x4b2   : > { %s1610_s9 = scalar_lea.hbm %s2061_s16, 384  ;;  %s1614_s12 = scalar_lea.hbm %s2117_s5, 768 }
 0x4b3   : > { %p1611_p0 = scmp.ne.s32.totalorder %s2061_s16, %s1610_s9  ;;  %p1615_p6 = scmp.lt.u32.totalorder %s2061_s16, %s2117_s5 }
 0x4b4   : > { %p1616_p7 = scmp.lt.u32.totalorder %s1614_s12, %s1610_s9  ;;  %p1618_p8 = scmp.lt.u32.totalorder %s1610_s9, %s2061_s16 }
 0x4b5   : > { %p1612_p4 = pnand %p1611_p0, %p2136_p12 }
 0x4b6   : > { %p1617_p11 = por %p1616_p7, %p1615_p6 }
 0x4b7   : > { %p1613_p13 = pneg %p1612_p4 }
 0x4b8   : > { %p1619_p1 = por %p1618_p8, %p1617_p11 }
 0x4ba   : > { %p1620_p10 = pnand %p1619_p1, %p1613_p13 }
 0x4bc   : > { %1623 = shalt.err (!%p1620_p10)
}
 0x4bd   : > { %s1692_s27 = smov 64   ;;  %s1693_s15 = smov 4  }
 0x4be   : > { %1396 = dma.vmem_to_hbm [thread:$0]  (%p2136_p12), %s2056_s6, 384, %s2061_s16, %s1064_s21, %s1692_s27, %s1692_s27, %s1693_s15  }
 0x4bf PF: > { %s1095_s26 = sand.u32 1, %s1662_s18   ;;  %p2137_p3 = scmp.ne.s32.totalorder %s2127_s29, 0 }
 0x4c0   : > { %p2138_p5 = scmp.ge.s32.totalorder %s1682_s23, 2  ;;  %s1096_s28 = scalar_lea.sflag [#allocation4], %s1095_s26 }
 0x4c2   : > { %p1410_p9 = pnand %p2138_p5, %p2137_p3 }
 0x4c4   : > { %1657 = dma.done.wait (!%p1410_p9), %s1096_s28, 384  }
 0x4c5   : > { %1659 = vsyncadd (!%p1410_p9), %s1096_s28, 4294966912  ;;  %s22_s23 = sadd.s32 1, %s1682_s23   ;;  %s2139_s18 = smov %s1666_s19 }
 0x4c6   : > { %p19_p2 = scmp.ge.s32.totalorder %s22_s23, 4   ;;  %s2140_s19 = smov %s1670_s20 }
 0x4c7   : > { %s2141_s20 = smov %s1875_s17  ;;  %s2142_s21 = smov %s1678_s22 }
 0x4c8   : > { %s2143_s22 = smov %s2145_s8  ;;  %21 = sbr.rel (!%p19_p2) target bundleno = 7 (0x7), region = 97 }
 0x4cf   :  { %1101 = vsyncpa [#allocation3], 1 }
 0x4d0   :  { %1103 = vsyncpa [#allocation3 + $0x1], 1 }
 0x4d1   :  { %1104 = vsyncpa [#allocation6], 1 }
 0x4d2   :  { %1105 = vsyncpa [#allocation4], 1 }
 0x4d3   :  { %1107 = vsyncpa [#allocation4 + $0x1], 1 }

</bundles_post_ra>
